<compile_context>
chip_gen: v7x
topology: tpu7x:2x2x1
jax: 0.10.0
libtpu: 0.0.40
codegen_flags: <defaults>
</compile_context>

<pallas_src>
import jax
import jax.numpy as jnp
from jax.experimental import pallas as pl
from jax.experimental.pallas import tpu as pltpu

# ----------------------------- model dimensions -----------------------------
NUM_OBS = 45                        # single-step proprioceptive obs
HIST = 6                            # history length
OBS_HIST = NUM_OBS * HIST           # 270
EST_H1, EST_H2, EST_OUT = 128, 64, 19     # encoder: vel(3) + latent(16) = 19
ACT_IN = NUM_OBS + 3 + 16                 # 64
ACT_H1, ACT_H2, NUM_ACTIONS = 128, 64, 12
BATCH = 2

# ----------------------------- packed-slab layout ----------------------------
LANES = 256                         # fused layer-1 output width (est 128 | act 128)
OBS_PAD = 384                       # 270 padded up to 3*128 (lane-full input vregs)
OUT_LANES = 128                     # output block lane width (real lanes 0..11)

# w2 slab: five 128-row x 128-lane weight blocks (bf16)
OFF_EW2 = 0                         # est.W2 (128x64)   in lanes 0..63
OFF_EW3 = 128                       # est.W3 (64x19)    in lanes 0..18
OFF_W1B = 256                       # act.W1[45:64] (19x128)
OFF_AW2 = 384                       # act.W2 (128x64)   in lanes 0..63
OFF_AW3 = 512                       # act.W3 (64x12)    in lanes 0..11
W2_ROWS = 640

# bias rows (separate small f32 array, one row per layer, broadcast in-kernel)
B_ROWS = 8                          # padded to a full sublane tile
ROW_BF1, ROW_BE2, ROW_BE3, ROW_BA2, ROW_BA3 = 0, 1, 2, 3, 4

MAX_BB = 256                        # max batch rows per grid step (128 is ideal on v5e)


def _round_up(x, m):
    return ((x + m - 1) // m) * m


def _elu(x):
    # torch.nn.ELU(alpha=1); clamp the exp argument so the dead branch stays finite.
    return jnp.where(x > 0.0, x, jnp.exp(jnp.minimum(x, 0.0)) - 1.0)


def him_policy_kernel(obs_ref, w1_ref, w2_ref, b_ref, out_ref):
    x = obs_ref[...]                                               # (bb, 384) f32

    # ---- fused layer 1: est.L1 (lanes 0..127) + actor.L1 obs45 part (128..255)
    w1 = w1_ref[...].astype(jnp.float32)                           # bf16 -> f32 (exact)
    y = (jnp.dot(x, w1, preferred_element_type=jnp.float32)
         + b_ref[ROW_BF1:ROW_BF1 + 1, :])                          # (bb, 256)
    h_est = _elu(y[:, 0:128])                                      # estimator hidden 1
    h1_obs = y[:, 128:256]                                         # obs45 @ aW1a + ab1

    # ---------------------------- estimator L2 / L3 --------------------------
    h2 = _elu(jnp.dot(h_est, w2_ref[OFF_EW2:OFF_EW2 + 128, :].astype(jnp.float32),
                      preferred_element_type=jnp.float32)
              + b_ref[ROW_BE2:ROW_BE2 + 1, 0:128])                 # real lanes 0..63
    parts = (jnp.dot(h2, w2_ref[OFF_EW3:OFF_EW3 + 128, :].astype(jnp.float32),
                     preferred_element_type=jnp.float32)
             + b_ref[ROW_BE3:ROW_BE3 + 1, 0:128])                  # real lanes 0..18

    # ---- F.normalize(z) as a per-lane scale: 1.0 on vel lanes, 1/||z|| on z lanes
    lane = jax.lax.broadcasted_iota(jnp.int32, (1, 128), 1)
    zmask = (lane >= 3) & (lane < EST_OUT)                         # lanes 3..18
    zvals = jnp.where(zmask, parts, 0.0)
    sumsq = jnp.sum(zvals * zvals, axis=-1, keepdims=True)         # (bb, 1)
    inv = jax.lax.rsqrt(jnp.maximum(sumsq, 1e-24))                 # == 1/max(||z||, 1e-12)
    parts_s = parts * jnp.where(zmask, inv, 1.0)                   # [vel | z_norm | 0..]

    # ------------------------------- actor -----------------------------------
    h1 = _elu(h1_obs
              + jnp.dot(parts_s, w2_ref[OFF_W1B:OFF_W1B + 128, :].astype(jnp.float32),
                        preferred_element_type=jnp.float32))       # (bb, 128)
    h2a = _elu(jnp.dot(h1, w2_ref[OFF_AW2:OFF_AW2 + 128, :].astype(jnp.float32),
                       preferred_element_type=jnp.float32)
               + b_ref[ROW_BA2:ROW_BA2 + 1, 0:128])                # real lanes 0..63
    out = (jnp.dot(h2a, w2_ref[OFF_AW3:OFF_AW3 + 128, :].astype(jnp.float32),
                   preferred_element_type=jnp.float32)
           + b_ref[ROW_BA3:ROW_BA3 + 1, 0:128])                    # real lanes 0..11

    out_ref[...] = out.astype(out_ref.dtype)


def quantize_weights(params):
    """Round weight matrices to bf16 (what the kernel sees); biases stay f32."""
    out = []
    for i, p in enumerate(params):
        if i % 2 == 0:                                             # weights
            p = p.astype(jnp.bfloat16).astype(jnp.float32)
        out.append(p)
    return tuple(out)


def pack_params(params):
    """Pack the 12 (in,out)-layout tensors into 2 bf16 weight slabs + f32 biases."""
    ew1, eb1, ew2, eb2, ew3, eb3, aw1, ab1, aw2, ab2, aw3, ab3 = params

    # fused layer-1 slab: [est.W1 | actor.W1 obs rows], zero padded to 384 x 256
    w1 = jnp.zeros((OBS_PAD, LANES), jnp.float32)
    w1 = w1.at[0:OBS_HIST, 0:EST_H1].set(ew1)
    w1 = w1.at[0:NUM_OBS, EST_H1:EST_H1 + ACT_H1].set(aw1[0:NUM_OBS, :])

    # hidden-layer slab: five 128-row x 128-lane blocks
    w2 = jnp.zeros((W2_ROWS, 128), jnp.float32)
    w2 = w2.at[OFF_EW2:OFF_EW2 + EST_H1, 0:EST_H2].set(ew2)
    w2 = w2.at[OFF_EW3:OFF_EW3 + EST_H2, 0:EST_OUT].set(ew3)
    w2 = w2.at[OFF_W1B:OFF_W1B + (ACT_IN - NUM_OBS), 0:ACT_H1].set(aw1[NUM_OBS:ACT_IN, :])
    w2 = w2.at[OFF_AW2:OFF_AW2 + ACT_H1, 0:ACT_H2].set(aw2)
    w2 = w2.at[OFF_AW3:OFF_AW3 + ACT_H2, 0:NUM_ACTIONS].set(aw3)

    # biases: one f32 row per layer, broadcast across the batch block in-kernel
    bias = jnp.zeros((B_ROWS, LANES), jnp.float32)
    bias = bias.at[ROW_BF1, 0:EST_H1].set(eb1[0])
    bias = bias.at[ROW_BF1, EST_H1:EST_H1 + ACT_H1].set(ab1[0])
    bias = bias.at[ROW_BE2, 0:EST_H2].set(eb2[0])
    bias = bias.at[ROW_BE3, 0:EST_OUT].set(eb3[0])
    bias = bias.at[ROW_BA2, 0:ACT_H2].set(ab2[0])
    bias = bias.at[ROW_BA3, 0:NUM_ACTIONS].set(ab3[0])

    return w1.astype(jnp.bfloat16), w2.astype(jnp.bfloat16), bias


def him_policy_forward(obs_history, w1, w2, bias):
    """obs_history: (B, 270) f32 ; w1/w2: packed bf16 weight slabs ; bias: (8,256) f32."""
    b = obs_history.shape[0]
    b8 = _round_up(max(b, 1), 8)
    # Batch block: up to MAX_BB rows per grid step (MXU row occupancy), but keep
    # >=2 parallel grid steps whenever the batch allows so both v7x TCs are used.
    n_blocks = max(pl.cdiv(b8, MAX_BB), 2 if b8 > 8 else 1)
    bb = min(MAX_BB, _round_up(pl.cdiv(b8, n_blocks), 8))
    padb = _round_up(b8, bb)

    # pad batch to full blocks and obs lanes 270 -> 384 (zeros)
    x = jnp.zeros((padb, OBS_PAD), jnp.float32).at[:b, :OBS_HIST].set(obs_history)

    out = pl.pallas_call(
        him_policy_kernel,
        out_shape=jax.ShapeDtypeStruct((padb, OUT_LANES), jnp.float32),
        grid=(padb // bb,),
        in_specs=[
            pl.BlockSpec((bb, OBS_PAD), lambda i: (i, 0)),
            # parameter slabs / biases are grid-invariant (constant index map ->
            # only fetched once across the grid).
            pl.BlockSpec((OBS_PAD, LANES), lambda i: (0, 0)),
            pl.BlockSpec((W2_ROWS, 128), lambda i: (0, 0)),
            pl.BlockSpec((B_ROWS, LANES), lambda i: (0, 0)),
        ],
        out_specs=pl.BlockSpec((bb, OUT_LANES), lambda i: (i, 0)),
        compiler_params=pltpu.CompilerParams(dimension_semantics=("parallel",)),
    )(x, w1, w2, bias)
    return out[:b, :NUM_ACTIONS]


def init_params(key):
    """Deterministic synthetic weights. Linear layers stored as (in, out)."""
    dims = [
        (OBS_HIST, EST_H1), (EST_H1, EST_H2), (EST_H2, EST_OUT),    # estimator
        (ACT_IN, ACT_H1), (ACT_H1, ACT_H2), (ACT_H2, NUM_ACTIONS),  # actor
    ]
    params = []
    for (din, dout) in dims:
        key, kw, kb = jax.random.split(key, 3)
        w = jax.random.normal(kw, (din, dout), jnp.float32) * (1.0 / jnp.sqrt(din))
        b = jax.random.normal(kb, (1, dout), jnp.float32) * 0.01
        params.extend([w, b])
    return tuple(params)


def reference_forward(obs_history, params):
    """Pure-JAX reference mirroring the PyTorch module exactly."""
    ew1, eb1, ew2, eb2, ew3, eb3, aw1, ab1, aw2, ab2, aw3, ab3 = params
    elu = lambda v: jnp.where(v > 0, v, jnp.exp(v) - 1.0)
    h = elu(obs_history @ ew1 + eb1)
    h = elu(h @ ew2 + eb2)
    parts = (h @ ew3 + eb3)[:, 0:19]
    vel, z = parts[..., :3], parts[..., 3:]
    z = z / jnp.maximum(jnp.linalg.norm(z, axis=-1, keepdims=True), 1e-12)
    a_in = jnp.concatenate((obs_history[:, 0:45], vel, z), axis=1)
    h = elu(a_in @ aw1 + ab1)
    h = elu(h @ aw2 + ab2)
    return h @ aw3 + ab3


if __name__ == "__main__":
    key = jax.random.PRNGKey(0)
    key, k_obs, k_obs2 = jax.random.split(key, 3)
    params = quantize_weights(init_params(key))        # bf16-rounded weights, f32 biases
    w1, w2, bias = pack_params(params)

    # deployment-style tiny batch (single grid step)
    obs_history = jax.random.normal(k_obs, (BATCH, OBS_HIST), jnp.float32)
    out = jax.block_until_ready(him_policy_forward(obs_history, w1, w2, bias))
    ref = reference_forward(obs_history, params)
    assert out.shape == (BATCH, NUM_ACTIONS)
    assert jnp.allclose(out, ref, atol=1e-3, rtol=1e-3), "mismatch vs reference (batch=2)"

    # larger batch exercising multiple parallel grid steps + batch padding
    obs_big = jax.random.normal(k_obs2, (40, OBS_HIST), jnp.float32)
    out_big = jax.block_until_ready(him_policy_forward(obs_big, w1, w2, bias))
    ref_big = reference_forward(obs_big, params)
    assert out_big.shape == (40, NUM_ACTIONS)
    assert jnp.allclose(out_big, ref_big, atol=1e-3, rtol=1e-3), "mismatch vs reference (batch=40)"

    print("KERNEL_OK")
</pallas_src>

<mosaic_0001>
module attributes {stable_mosaic.version = 11 : i64} {
  func.func @him_policy_kernel(%arg0: i32, %arg1: memref<8x384xf32, #tpu.memory_space<vmem>>, %arg2: memref<384x256xbf16, #tpu.memory_space<vmem>>, %arg3: memref<640x128xbf16, #tpu.memory_space<vmem>>, %arg4: memref<8x256xf32, #tpu.memory_space<vmem>>, %arg5: memref<8x128xf32, #tpu.memory_space<vmem>>) attributes {dimension_semantics = [#tpu.dimension_semantics<parallel>], iteration_bounds = array<i64: 1>, scalar_prefetch = 0 : i64, scratch_operands = 0 : i64, tpu.core_type = #tpu.core_type<tc>, window_params = [{transform_indices = @transform_0, window_bounds = array<i64: 8, 384>}, {pipeline_mode = #tpu.pipeline_mode<synchronous>, transform_indices = @transform_1, window_bounds = array<i64: 384, 256>}, {pipeline_mode = #tpu.pipeline_mode<synchronous>, transform_indices = @transform_2, window_bounds = array<i64: 640, 128>}, {pipeline_mode = #tpu.pipeline_mode<synchronous>, transform_indices = @transform_3, window_bounds = array<i64: 8, 256>}, {transform_indices = @transform_4, window_bounds = array<i64: 8, 128>}]} {
    %c0 = arith.constant 0 : index
    %c0_0 = arith.constant 0 : index
    %0 = vector.load %arg1[%c0, %c0_0] : memref<8x384xf32, #tpu.memory_space<vmem>>, vector<8x384xf32>
    %c0_1 = arith.constant 0 : index
    %c0_2 = arith.constant 0 : index
    %1 = vector.load %arg2[%c0_1, %c0_2] : memref<384x256xbf16, #tpu.memory_space<vmem>>, vector<384x256xbf16>
    %2 = arith.extf %1 : vector<384x256xbf16> to vector<384x256xf32>
    %cst = arith.constant dense<0.000000e+00> : vector<8x256xf32>
    %3 = tpu.matmul %0, %2, %cst {dimension_numbers = #tpu.dot_dimension_numbers<[1], [0], [0], [1], [0, 0, 1, 1], [], []>} : vector<8x384xf32>, vector<384x256xf32>, vector<8x256xf32> -> vector<8x256xf32>
    %c0_3 = arith.constant 0 : index
    %c0_4 = arith.constant 0 : index
    %4 = vector.load %arg4[%c0_3, %c0_4] : memref<8x256xf32, #tpu.memory_space<vmem>>, vector<1x256xf32>
    %5 = vector.broadcast %4 : vector<1x256xf32> to vector<8x256xf32>
    %6 = arith.addf %3, %5 : vector<8x256xf32>
    %7 = vector.extract_strided_slice %6 {offsets = [0, 0], sizes = [8, 128], strides = [1, 1]} : vector<8x256xf32> to vector<8x128xf32>
    %cst_5 = arith.constant 0.000000e+00 : f32
    %8 = vector.broadcast %cst_5 : f32 to vector<8x128xf32>
    %9 = arith.cmpf ogt, %7, %8 : vector<8x128xf32>
    %cst_6 = arith.constant 0.000000e+00 : f32
    %10 = vector.broadcast %cst_6 : f32 to vector<8x128xf32>
    %11 = arith.minimumf %7, %10 : vector<8x128xf32>
    %12 = math.exp %11 : vector<8x128xf32>
    %cst_7 = arith.constant 1.000000e+00 : f32
    %13 = vector.broadcast %cst_7 : f32 to vector<8x128xf32>
    %14 = arith.subf %12, %13 : vector<8x128xf32>
    %15 = arith.select %9, %7, %14 : vector<8x128xi1>, vector<8x128xf32>
    %16 = vector.extract_strided_slice %6 {offsets = [0, 128], sizes = [8, 128], strides = [1, 1]} : vector<8x256xf32> to vector<8x128xf32>
    %c0_8 = arith.constant 0 : index
    %c0_9 = arith.constant 0 : index
    %17 = vector.load %arg3[%c0_8, %c0_9] : memref<640x128xbf16, #tpu.memory_space<vmem>>, vector<128x128xbf16>
    %18 = arith.extf %17 : vector<128x128xbf16> to vector<128x128xf32>
    %cst_10 = arith.constant dense<0.000000e+00> : vector<8x128xf32>
    %19 = tpu.matmul %15, %18, %cst_10 {dimension_numbers = #tpu.dot_dimension_numbers<[1], [0], [0], [1], [0, 0, 1, 1], [], []>} : vector<8x128xf32>, vector<128x128xf32>, vector<8x128xf32> -> vector<8x128xf32>
    %c1 = arith.constant 1 : index
    %c0_11 = arith.constant 0 : index
    %20 = vector.load %arg4[%c1, %c0_11] : memref<8x256xf32, #tpu.memory_space<vmem>>, vector<1x128xf32>
    %21 = vector.broadcast %20 : vector<1x128xf32> to vector<8x128xf32>
    %22 = arith.addf %19, %21 : vector<8x128xf32>
    %cst_12 = arith.constant 0.000000e+00 : f32
    %23 = vector.broadcast %cst_12 : f32 to vector<8x128xf32>
    %24 = arith.cmpf ogt, %22, %23 : vector<8x128xf32>
    %cst_13 = arith.constant 0.000000e+00 : f32
    %25 = vector.broadcast %cst_13 : f32 to vector<8x128xf32>
    %26 = arith.minimumf %22, %25 : vector<8x128xf32>
    %27 = math.exp %26 : vector<8x128xf32>
    %cst_14 = arith.constant 1.000000e+00 : f32
    %28 = vector.broadcast %cst_14 : f32 to vector<8x128xf32>
    %29 = arith.subf %27, %28 : vector<8x128xf32>
    %30 = arith.select %24, %22, %29 : vector<8x128xi1>, vector<8x128xf32>
    %c128 = arith.constant 128 : index
    %c0_15 = arith.constant 0 : index
    %31 = vector.load %arg3[%c128, %c0_15] : memref<640x128xbf16, #tpu.memory_space<vmem>>, vector<128x128xbf16>
    %32 = arith.extf %31 : vector<128x128xbf16> to vector<128x128xf32>
    %cst_16 = arith.constant dense<0.000000e+00> : vector<8x128xf32>
    %33 = tpu.matmul %30, %32, %cst_16 {dimension_numbers = #tpu.dot_dimension_numbers<[1], [0], [0], [1], [0, 0, 1, 1], [], []>} : vector<8x128xf32>, vector<128x128xf32>, vector<8x128xf32> -> vector<8x128xf32>
    %c2 = arith.constant 2 : index
    %c0_17 = arith.constant 0 : index
    %34 = vector.load %arg4[%c2, %c0_17] : memref<8x256xf32, #tpu.memory_space<vmem>>, vector<1x128xf32>
    %35 = vector.broadcast %34 : vector<1x128xf32> to vector<8x128xf32>
    %36 = arith.addf %33, %35 : vector<8x128xf32>
    %37 = tpu.iota {dimensions = array<i32: 1>} : vector<1x128xi32>
    %c3_i32 = arith.constant 3 : i32
    %38 = vector.broadcast %c3_i32 : i32 to vector<1x128xi32>
    %39 = arith.cmpi sge, %37, %38 : vector<1x128xi32>
    %c19_i32 = arith.constant 19 : i32
    %40 = vector.broadcast %c19_i32 : i32 to vector<1x128xi32>
    %41 = arith.cmpi slt, %37, %40 : vector<1x128xi32>
    %42 = arith.andi %39, %41 : vector<1x128xi1>
    %cst_18 = arith.constant 0.000000e+00 : f32
    %43 = vector.shape_cast %42 : vector<1x128xi1> to vector<1x128xi1>
    %44 = vector.broadcast %43 : vector<1x128xi1> to vector<8x128xi1>
    %45 = vector.broadcast %cst_18 : f32 to vector<8x128xf32>
    %46 = arith.select %44, %36, %45 : vector<8x128xi1>, vector<8x128xf32>
    %47 = arith.mulf %46, %46 : vector<8x128xf32>
    %cst_19 = arith.constant dense<0.000000e+00> : vector<8xf32>
    %48 = vector.multi_reduction <add>, %47, %cst_19 [1] : vector<8x128xf32> to vector<8xf32>
    %49 = vector.shape_cast %48 : vector<8xf32> to vector<8x1xf32>
    %cst_20 = arith.constant 1.000000e-24 : f32
    %50 = vector.broadcast %cst_20 : f32 to vector<8x1xf32>
    %51 = arith.maximumf %49, %50 : vector<8x1xf32>
    %52 = math.rsqrt %51 : vector<8x1xf32>
    %cst_21 = arith.constant 1.000000e+00 : f32
    %53 = vector.shape_cast %42 : vector<1x128xi1> to vector<1x128xi1>
    %54 = vector.broadcast %53 : vector<1x128xi1> to vector<8x128xi1>
    %55 = vector.shape_cast %52 : vector<8x1xf32> to vector<8x1xf32>
    %56 = vector.broadcast %55 : vector<8x1xf32> to vector<8x128xf32>
    %57 = vector.broadcast %cst_21 : f32 to vector<8x128xf32>
    %58 = arith.select %54, %56, %57 : vector<8x128xi1>, vector<8x128xf32>
    %59 = arith.mulf %36, %58 : vector<8x128xf32>
    %c256 = arith.constant 256 : index
    %c0_22 = arith.constant 0 : index
    %60 = vector.load %arg3[%c256, %c0_22] : memref<640x128xbf16, #tpu.memory_space<vmem>>, vector<128x128xbf16>
    %61 = arith.extf %60 : vector<128x128xbf16> to vector<128x128xf32>
    %cst_23 = arith.constant dense<0.000000e+00> : vector<8x128xf32>
    %62 = tpu.matmul %59, %61, %cst_23 {dimension_numbers = #tpu.dot_dimension_numbers<[1], [0], [0], [1], [0, 0, 1, 1], [], []>} : vector<8x128xf32>, vector<128x128xf32>, vector<8x128xf32> -> vector<8x128xf32>
    %63 = arith.addf %16, %62 : vector<8x128xf32>
    %cst_24 = arith.constant 0.000000e+00 : f32
    %64 = vector.broadcast %cst_24 : f32 to vector<8x128xf32>
    %65 = arith.cmpf ogt, %63, %64 : vector<8x128xf32>
    %cst_25 = arith.constant 0.000000e+00 : f32
    %66 = vector.broadcast %cst_25 : f32 to vector<8x128xf32>
    %67 = arith.minimumf %63, %66 : vector<8x128xf32>
    %68 = math.exp %67 : vector<8x128xf32>
    %cst_26 = arith.constant 1.000000e+00 : f32
    %69 = vector.broadcast %cst_26 : f32 to vector<8x128xf32>
    %70 = arith.subf %68, %69 : vector<8x128xf32>
    %71 = arith.select %65, %63, %70 : vector<8x128xi1>, vector<8x128xf32>
    %c384 = arith.constant 384 : index
    %c0_27 = arith.constant 0 : index
    %72 = vector.load %arg3[%c384, %c0_27] : memref<640x128xbf16, #tpu.memory_space<vmem>>, vector<128x128xbf16>
    %73 = arith.extf %72 : vector<128x128xbf16> to vector<128x128xf32>
    %cst_28 = arith.constant dense<0.000000e+00> : vector<8x128xf32>
    %74 = tpu.matmul %71, %73, %cst_28 {dimension_numbers = #tpu.dot_dimension_numbers<[1], [0], [0], [1], [0, 0, 1, 1], [], []>} : vector<8x128xf32>, vector<128x128xf32>, vector<8x128xf32> -> vector<8x128xf32>
    %c3 = arith.constant 3 : index
    %c0_29 = arith.constant 0 : index
    %75 = vector.load %arg4[%c3, %c0_29] : memref<8x256xf32, #tpu.memory_space<vmem>>, vector<1x128xf32>
    %76 = vector.broadcast %75 : vector<1x128xf32> to vector<8x128xf32>
    %77 = arith.addf %74, %76 : vector<8x128xf32>
    %cst_30 = arith.constant 0.000000e+00 : f32
    %78 = vector.broadcast %cst_30 : f32 to vector<8x128xf32>
    %79 = arith.cmpf ogt, %77, %78 : vector<8x128xf32>
    %cst_31 = arith.constant 0.000000e+00 : f32
    %80 = vector.broadcast %cst_31 : f32 to vector<8x128xf32>
    %81 = arith.minimumf %77, %80 : vector<8x128xf32>
    %82 = math.exp %81 : vector<8x128xf32>
    %cst_32 = arith.constant 1.000000e+00 : f32
    %83 = vector.broadcast %cst_32 : f32 to vector<8x128xf32>
    %84 = arith.subf %82, %83 : vector<8x128xf32>
    %85 = arith.select %79, %77, %84 : vector<8x128xi1>, vector<8x128xf32>
    %c512 = arith.constant 512 : index
    %c0_33 = arith.constant 0 : index
    %86 = vector.load %arg3[%c512, %c0_33] : memref<640x128xbf16, #tpu.memory_space<vmem>>, vector<128x128xbf16>
    %87 = arith.extf %86 : vector<128x128xbf16> to vector<128x128xf32>
    %cst_34 = arith.constant dense<0.000000e+00> : vector<8x128xf32>
    %88 = tpu.matmul %85, %87, %cst_34 {dimension_numbers = #tpu.dot_dimension_numbers<[1], [0], [0], [1], [0, 0, 1, 1], [], []>} : vector<8x128xf32>, vector<128x128xf32>, vector<8x128xf32> -> vector<8x128xf32>
    %c4 = arith.constant 4 : index
    %c0_35 = arith.constant 0 : index
    %89 = vector.load %arg4[%c4, %c0_35] : memref<8x256xf32, #tpu.memory_space<vmem>>, vector<1x128xf32>
    %90 = vector.broadcast %89 : vector<1x128xf32> to vector<8x128xf32>
    %91 = arith.addf %88, %90 : vector<8x128xf32>
    %c0_36 = arith.constant 0 : index
    %c0_37 = arith.constant 0 : index
    %92 = vector.load %arg5[%c0_36, %c0_37] : memref<8x128xf32, #tpu.memory_space<vmem>>, vector<8x128xf32>
    tpu.vector_store %arg5[%c0_36, %c0_37], %91 {strides = array<i32>} : memref<8x128xf32, #tpu.memory_space<vmem>>, vector<8x128xf32>,
    return
  }
  func.func @transform_0(%arg0: i32) -> (i32, i32) {
    %c0_i32 = arith.constant 0 : i32
    %c0_i32_0 = arith.constant 0 : i32
    return %arg0, %c0_i32 : i32, i32
  }
  func.func @transform_1(%arg0: i32) -> (i32, i32) {
    %c0_i32 = arith.constant 0 : i32
    %c0_i32_0 = arith.constant 0 : i32
    %c0_i32_1 = arith.constant 0 : i32
    return %c0_i32, %c0_i32_0 : i32, i32
  }
  func.func @transform_2(%arg0: i32) -> (i32, i32) {
    %c0_i32 = arith.constant 0 : i32
    %c0_i32_0 = arith.constant 0 : i32
    %c0_i32_1 = arith.constant 0 : i32
    return %c0_i32, %c0_i32_0 : i32, i32
  }
  func.func @transform_3(%arg0: i32) -> (i32, i32) {
    %c0_i32 = arith.constant 0 : i32
    %c0_i32_0 = arith.constant 0 : i32
    %c0_i32_1 = arith.constant 0 : i32
    return %c0_i32, %c0_i32_0 : i32, i32
  }
  func.func @transform_4(%arg0: i32) -> (i32, i32) {
    %c0_i32 = arith.constant 0 : i32
    %c0_i32_0 = arith.constant 0 : i32
    return %arg0, %c0_i32 : i32, i32
  }
}

</mosaic_0001>

<bundles_post_ra>
// kernel: tpu_custom_call.1
= control target key start
LH: loop header
LB: loop body
LE: loop exit
PB: predicated region body
PF: predicated region fallthrough
CT: control target
= control target key end

     0   :  { %9 = vsyncpa [#allocation3], 0  ;;  %s2054_s0 = inlined_call_operand.hbm [shape: f32[8,384], index: 0, kind: input, shape index: {}]   ;;  %s2055_s1 = inlined_call_operand.hbm [shape: bf16[384,256], index: 1, kind: input, shape index: {}]   ;;  %s2056_s2 = inlined_call_operand.hbm [shape: bf16[640,128], index: 2, kind: input, shape index: {}]   ;;  %s2057_s3 = inlined_call_operand.hbm [shape: f32[8,256], index: 3, kind: input, shape index: {}]   ;;  %s2058_s4 = inlined_call_operand.hbm [shape: f32[8,128], index: 4, kind: output, shape index: {}]  }
   0x1   :  { %10 = vsyncpa [#allocation6], 0 }
   0x2   :  { %11 = vsyncpa [#allocation9], 0 }
   0x3   :  { %12 = vsyncpa [#allocation4], 0  ;;  %s1885_s15 = smov [#allocation5]   ;;  %s1767_s19 = scalar_lea.hbm %s2055_s1, 6144 }
   0x4   :  { %s28_s16 = sshll.u32 %s1885_s15, 4  ;;  %p1768_p0 = scmp.ne.s32.totalorder %s2055_s1, %s1767_s19  ;;  %s29_s16 = int_to_ptr.vmem [resolvable:$true] %s28_s16 }
   0x5   :  { %p1771_p1 = scmp.lt.u32.totalorder %s1767_s19, %s2055_s1 }
   0x7   :  { %p1773_p2 = pnand %p1771_p1, %p1768_p0 }
   0x9   :  { %1776 = shalt.err (!%p1773_p2)
}
   0xa   :  { %s1777_s24 = scalar_lea.vmem %s29_s16, 6144  ;;  %p1782_p4 = scmp.lt.s32.totalorder %s29_s16, %s29_s16 }
   0xb   :  { %p1778_p3 = scmp.ne.s32.totalorder %s29_s16, %s1777_s24  ;;  %p1783_p5 = scmp.lt.s32.totalorder %s1777_s24, %s1777_s24 }
   0xd   :  { %p1784_p6 = por %p1783_p5, %p1782_p4 }
   0xf   :  { %p1785_p7 = pnand %p1784_p6, %p1778_p3 }
  0x11   :  { %1788 = shalt.err (!%p1785_p7)
}
  0x12   :  { %s1886_s25 = smov 128   ;;  %s1887_s26 = smov 8  }
  0x13   :  { %34 = dma.hbm_to_vmem [thread:$0]  %s2055_s1, 6144, %s29_s16, [#allocation6], %s1886_s25, %s1886_s25, %s1887_s26  }
  0x14   :  { %s1888_s29 = smov [#allocation2]   ;;  %s1889_s5 = smov [#allocation7]  }
  0x15   :  { %s19_s30 = sshll.u32 %s1888_s29, 4  ;;  %s40_s6 = sshll.u32 %s1889_s5, 4  ;;  %s20_s30 = int_to_ptr.vmem [resolvable:$true] %s19_s30  ;;  %s41_s6 = int_to_ptr.vmem [resolvable:$true] %s40_s6 }
  0x16   :  { %s1789_s9 = scalar_lea.hbm %s2054_s0, 384 }
  0x17   :  { %p1790_p8 = scmp.ne.s32.totalorder %s2054_s0, %s1789_s9  ;;  %p1793_p9 = scmp.lt.u32.totalorder %s1789_s9, %s2054_s0 }
  0x19   :  { %p1795_p10 = pnand %p1793_p9, %p1790_p8 }
  0x1b   :  { %1798 = shalt.err (!%p1795_p10)
}
  0x1c   :  { %s1799_s1 = scalar_lea.vmem %s20_s30, 384  ;;  %p1804_p12 = scmp.lt.s32.totalorder %s20_s30, %s20_s30 }
  0x1d   :  { %p1800_p11 = scmp.ne.s32.totalorder %s20_s30, %s1799_s1  ;;  %p1805_p13 = scmp.lt.s32.totalorder %s1799_s1, %s1799_s1 }
  0x1f   :  { %p1806_p0 = por %p1805_p13, %p1804_p12 }
  0x21   :  { %p1807_p1 = pnand %p1806_p0, %p1800_p11 }
  0x23   :  { %1810 = shalt.err (!%p1807_p1)
}
  0x24   :  { %22 = dma.hbm_to_vmem [thread:$0]  %s2054_s0, 384, %s20_s30, [#allocation3]  }
  0x25   :  { %s1811_s18 = scalar_lea.hbm %s2056_s2, 5120 }
  0x26   :  { %p1812_p2 = scmp.ne.s32.totalorder %s2056_s2, %s1811_s18  ;;  %p1815_p3 = scmp.lt.u32.totalorder %s1811_s18, %s2056_s2 }
  0x28   :  { %p1817_p4 = pnand %p1815_p3, %p1812_p2 }
  0x2a   :  { %1820 = shalt.err (!%p1817_p4)
}
  0x2b   :  { %s1821_s23 = scalar_lea.vmem %s41_s6, 5120  ;;  %p1826_p6 = scmp.lt.s32.totalorder %s41_s6, %s41_s6 }
  0x2c   :  { %p1822_p5 = scmp.ne.s32.totalorder %s41_s6, %s1821_s23  ;;  %p1827_p7 = scmp.lt.s32.totalorder %s1821_s23, %s1821_s23 }
  0x2e   :  { %p1828_p8 = por %p1827_p7, %p1826_p6 }
  0x30   :  { %p1829_p9 = pnand %p1828_p8, %p1822_p5 }
  0x32   :  { %1832 = shalt.err (!%p1829_p9)
}
  0x33   :  { %s1890_s0 = smov 64   ;;  %s1891_s24 = smov 4  }
  0x34   :  { %46 = dma.hbm_to_vmem [thread:$0]  %s2056_s2, 5120, %s41_s6, [#allocation6], %s1890_s0, %s1890_s0, %s1891_s24  }
  0x35   :  { %s1892_s27 = smov [#allocation8]   ;;  %s1833_s5 = scalar_lea.hbm %s2057_s3, 256 }
  0x36   :  { %s53_s28 = sshll.u32 %s1892_s27, 4  ;;  %p1834_p10 = scmp.ne.s32.totalorder %s2057_s3, %s1833_s5  ;;  %s54_s28 = int_to_ptr.vmem [resolvable:$true] %s53_s28 }
  0x37   :  { %p1837_p11 = scmp.lt.u32.totalorder %s1833_s5, %s2057_s3 }
  0x39   :  { %p1839_p12 = pnand %p1837_p11, %p1834_p10 }
  0x3b   :  { %1842 = shalt.err (!%p1839_p12)
}
  0x3c   :  { %s1843_s11 = scalar_lea.vmem %s54_s28, 256  ;;  %p1848_p0 = scmp.lt.s32.totalorder %s54_s28, %s54_s28 }
  0x3d   :  { %p1844_p13 = scmp.ne.s32.totalorder %s54_s28, %s1843_s11  ;;  %p1849_p1 = scmp.lt.s32.totalorder %s1843_s11, %s1843_s11 }
  0x3f   :  { %p1850_p2 = por %p1849_p1, %p1848_p0 }
  0x41   :  { %p1851_p3 = pnand %p1850_p2, %p1844_p13 }
  0x43   :  { %1854 = shalt.err (!%p1851_p3)
}
  0x44   :  { %56 = dma.hbm_to_vmem [thread:$0]  %s2057_s3, 256, %s54_s28, [#allocation9]  }
  0x45   :  { %1877 = dma.done.wait [#allocation3], 384  }
  0x46   :  { %1878 = vsyncadd [#allocation3], 4294966912 }
  0x47   :  { %1879 = dma.done.wait [#allocation6], 11264  }
  0x48   :  { %1880 = vsyncadd [#allocation6], 4294956032 }
  0x49   :  { %1881 = dma.done.wait [#allocation9], 256  }
  0x4a   :  { %1882 = vsyncadd [#allocation9], 4294967040  ;;  %v1893_v0 = vmov 0.0|0.0   ;;  %v1685_v1 = vld [vmem:[#allocation5 + $0x4] ss:$8 sps:$4 sm:$0xff]   ;;  %v70_v14 = vld [vmem:[#allocation2 + $0x8] sm:$0xff]  ;;  %v218_v61 = vlaneseq }
  0x4b   :  { %1501 = vmatprep.subr.bf16.mxu1 %v1893_v0  ;;  %v1687_v2 = vld [vmem:[#allocation5] ss:$8 sps:$4 sm:$0xff]   ;;  %1406 = vmatprep.subr.bf16.mxu0 %v1685_v1  ;;  %v1688_v3 = vld [vmem:[#allocation5 + $0x14] ss:$8 sps:$4 sm:$0xff]   ;;  %v1690_v4 = vld [vmem:[#allocation5 + $0x10] ss:$8 sps:$4 sm:$0xff]  }
  0x4c   :  { %1408 = vmatpush1.bf16.msra.mxu0 %v1687_v2  ;;  %v1691_v5 = vld [vmem:[#allocation5 + $0x24] ss:$8 sps:$4 sm:$0xff]   ;;  %v1693_v6 = vld [vmem:[#allocation5 + $0x20] ss:$8 sps:$4 sm:$0xff]   ;;  %v1694_v7 = vld [vmem:[#allocation5 + $0x34] ss:$8 sps:$4 sm:$0xff]   ;;  %292 = vmatprep.mubr.f32.mxu0 %v70_v14 }
  0x4d   :  { %1410 = vmatprep.subr.bf16.mxu0 %v1688_v3  ;;  %v1696_v8 = vld [vmem:[#allocation5 + $0x30] ss:$8 sps:$4 sm:$0xff]   ;;  %v1697_v9 = vld [vmem:[#allocation5 + $0x44] ss:$8 sps:$4 sm:$0xff]   ;;  %v1699_v10 = vld [vmem:[#allocation5 + $0x40] ss:$8 sps:$4 sm:$0xff]  }
  0x4e   :  { %v1700_v11 = vld [vmem:[#allocation5 + $0x54] ss:$8 sps:$4 sm:$0xff]   ;;  %v1702_v12 = vld [vmem:[#allocation5 + $0x50] ss:$8 sps:$4 sm:$0xff]   ;;  %v1703_v13 = vld [vmem:[#allocation5 + $0x64] ss:$8 sps:$4 sm:$0xff]  }
  0x4f   :  { %v1705_v15 = vld [vmem:[#allocation5 + $0x60] ss:$8 sps:$4 sm:$0xff]   ;;  %v1706_v16 = vld [vmem:[#allocation5 + $0x74] ss:$8 sps:$4 sm:$0xff]   ;;  %v1708_v17 = vld [vmem:[#allocation5 + $0x70] ss:$8 sps:$4 sm:$0xff]  }
  0x50   :  { %1412 = vmatpush1.bf16.msra.mxu0 %v1690_v4  ;;  %v1709_v18 = vld [vmem:[#allocation5 + $0x84] ss:$8 sps:$4 sm:$0xff]   ;;  %v1711_v19 = vld [vmem:[#allocation5 + $0x80] ss:$8 sps:$4 sm:$0xff]   ;;  %v1712_v20 = vld [vmem:[#allocation5 + $0x94] ss:$8 sps:$4 sm:$0xff]  }
  0x51   :  { %1414 = vmatprep.subr.bf16.mxu0 %v1691_v5  ;;  %v947_v21 = vld [vmem:[#allocation7] sm:$0xff]   ;;  %v1714_v22 = vld [vmem:[#allocation5 + $0x90] ss:$8 sps:$4 sm:$0xff]   ;;  %v1106_v23 = vld [vmem:[#allocation7 + $0x8] sm:$0xff]   ;;  %v1894_v42 = vmov 0.0   ;;  %vm1895_vm0 = vmmov 0  }
  0x52   :  { %1503 = vmatpush3.bf16.msra.mxu1 %v947_v21  ;;  %v1715_v24 = vld [vmem:[#allocation5 + $0xa4] ss:$8 sps:$4 sm:$0xff]   ;;  %v1717_v25 = vld [vmem:[#allocation5 + $0xa0] ss:$8 sps:$4 sm:$0xff]   ;;  %v1107_v26 = vld [vmem:[#allocation7 + $0x10] sm:$0xff]   ;;  %1262 = vmatprep.mubr.msk.f32.mxu1 %vm1895_vm0, %v1894_v42  ;;  %v1986_v62 = vshrl.u32 %v218_v61, 7 }
  0x53   :  { %1504 = vmatprep.subr.bf16.mxu1 %v1893_v0  ;;  %v1718_v27 = vld [vmem:[#allocation5 + $0xb4] ss:$8 sps:$4 sm:$0xff]   ;;  %v1720_v28 = vld [vmem:[#allocation5 + $0xb0] ss:$8 sps:$4 sm:$0xff]   ;;  %v1721_v29 = vld [vmem:[#allocation5 + $0xc4] ss:$8 sps:$4 sm:$0xff]  }
  0x54   :  { %1416 = vmatpush1.bf16.msra.mxu0 %v1693_v6  ;;  %v1723_v30 = vld [vmem:[#allocation5 + $0xc0] ss:$8 sps:$4 sm:$0xff]   ;;  %v1724_v31 = vld [vmem:[#allocation5 + $0xd4] ss:$8 sps:$4 sm:$0xff]   ;;  %v1726_v32 = vld [vmem:[#allocation5 + $0xd0] ss:$8 sps:$4 sm:$0xff]  }
  0x55   :  { %1418 = vmatprep.subr.bf16.mxu0 %v1694_v7  ;;  %v1727_v33 = vld [vmem:[#allocation5 + $0xe4] ss:$8 sps:$4 sm:$0xff]   ;;  %v1729_v34 = vld [vmem:[#allocation5 + $0xe0] ss:$8 sps:$4 sm:$0xff]   ;;  %v1730_v35 = vld [vmem:[#allocation5 + $0xf4] ss:$8 sps:$4 sm:$0xff]  }
  0x56   :  { %1506 = vmatpush3.bf16.msra.mxu1 %v1106_v23  ;;  %v1732_v36 = vld [vmem:[#allocation5 + $0xf0] ss:$8 sps:$4 sm:$0xff]   ;;  %v1733_v37 = vld [vmem:[#allocation5 + $0x104] ss:$8 sps:$4 sm:$0xff]   ;;  %v1735_v38 = vld [vmem:[#allocation5 + $0x100] ss:$8 sps:$4 sm:$0xff]  }
  0x57   :  { %1507 = vmatprep.subr.bf16.mxu1 %v1893_v0  ;;  %v69_v39 = vld [vmem:[#allocation2] sm:$0xff]  ;;  %v1736_v40 = vld [vmem:[#allocation5 + $0x114] ss:$8 sps:$4 sm:$0xff]   ;;  %v1738_v41 = vld [vmem:[#allocation5 + $0x110] ss:$8 sps:$4 sm:$0xff]   ;;  %v220_v63 = vsub.s32 0, %v1986_v62 }
  0x58   :  { %1420 = vmatpush1.bf16.msra.mxu0 %v1696_v8  ;;  %v1739_v43 = vld [vmem:[#allocation5 + $0x124] ss:$8 sps:$4 sm:$0xff]   ;;  %v1741_v44 = vld [vmem:[#allocation5 + $0x120] ss:$8 sps:$4 sm:$0xff]   ;;  %v1742_v45 = vld [vmem:[#allocation5 + $0x134] ss:$8 sps:$4 sm:$0xff]  }
  0x59   :  { %1422 = vmatprep.subr.bf16.mxu0 %v1697_v9  ;;  %v1744_v46 = vld [vmem:[#allocation5 + $0x130] ss:$8 sps:$4 sm:$0xff]   ;;  %v1745_v47 = vld [vmem:[#allocation5 + $0x144] ss:$8 sps:$4 sm:$0xff]   ;;  %v1747_v48 = vld [vmem:[#allocation5 + $0x140] ss:$8 sps:$4 sm:$0xff]  }
  0x5a   :  { %1509 = vmatpush3.bf16.msra.mxu1 %v1107_v26  ;;  %v1748_v49 = vld [vmem:[#allocation5 + $0x154] ss:$8 sps:$4 sm:$0xff]   ;;  %v1750_v50 = vld [vmem:[#allocation5 + $0x150] ss:$8 sps:$4 sm:$0xff]   ;;  %v1751_v51 = vld [vmem:[#allocation5 + $0x164] ss:$8 sps:$4 sm:$0xff]  }
  0x5b   :  { %1510 = vmatprep.subr.bf16.mxu1 %v1893_v0  ;;  %v1753_v52 = vld [vmem:[#allocation5 + $0x160] ss:$8 sps:$4 sm:$0xff]   ;;  %v1754_v53 = vld [vmem:[#allocation5 + $0x174] ss:$8 sps:$4 sm:$0xff]   ;;  %v1756_v54 = vld [vmem:[#allocation5 + $0x170] ss:$8 sps:$4 sm:$0xff]  }
  0x5c   :  { %1424 = vmatpush1.bf16.msra.mxu0 %v1699_v10  ;;  %v71_v55 = vld [vmem:[#allocation2 + $0x10] sm:$0xff]  ;;  %v1109_v57 = vld [vmem:[#allocation7 + $0x20] sm:$0xff]   ;;  %v1110_v58 = vld [vmem:[#allocation7 + $0x28] sm:$0xff]   ;;  %s1896_s3 = smov [#allocation10]  }
  0x5d   :  { %1426 = vmatprep.subr.bf16.mxu0 %v1700_v11  ;;  %v1108_v56 = vld [vmem:[#allocation7 + $0x18] sm:$0xff]   ;;  %v1111_v59 = vld [vmem:[#allocation7 + $0x30] sm:$0xff]   ;;  %v1989_v1 = vld [vmem:[#allocation8] ss:$8 sm:$0x3]  ;;  %s931_s12 = sshll.u32 %s1896_s3, 4  ;;  %s932_s12 = int_to_ptr.vmem [resolvable:$true] %s931_s12 }
  0x5e   :  { %1512 = vmatpush3.bf16.msra.mxu1 %v1108_v56  ;;  %v1112_v60 = vld [vmem:[#allocation7 + $0x38] sm:$0xff]   ;;  %v221_v2 = vrot.slane %v1989_v1, %v220_v63  ;;  %v1113_v10 = vld [vmem:[#allocation7 + $0x40] sm:$0xff]   ;;  %v1135_v56 = vld [vmem:[#allocation7 + $0xf0] sm:$0xff]   ;;  %s1855_s13 = scalar_lea.vmem %s932_s12, 128  ;;  %p1860_p5 = scmp.lt.s32.totalorder %s932_s12, %s932_s12 }
  0x5f   :  { %1513 = vmatprep.subr.bf16.mxu1 %v1893_v0  ;;  %v1116_v14 = vld [vmem:[#allocation7 + $0x58] sm:$0xff]   ;;  %p1856_p4 = scmp.ne.s32.totalorder %s932_s12, %s1855_s13  ;;  %p1861_p6 = scmp.lt.s32.totalorder %s1855_s13, %s1855_s13 }
  0x60   :  { %1428 = vmatpush1.bf16.msra.mxu0 %v1702_v12  ;;  %v1114_v12 = vld [vmem:[#allocation7 + $0x48] sm:$0xff]  }
  0x61   :  { %1430 = vmatprep.subr.bf16.mxu0 %v1703_v13  ;;  %v1115_v13 = vld [vmem:[#allocation7 + $0x50] sm:$0xff]   ;;  %p1862_p7 = por %p1861_p6, %p1860_p5 }
  0x62   :  { %1515 = vmatpush3.bf16.msra.mxu1 %v1109_v57  ;;  %v1136_v57 = vld [vmem:[#allocation7 + $0xf8] sm:$0xff]  }
  0x63   :  { %1516 = vmatprep.subr.bf16.mxu1 %v1893_v0  ;;  %p1863_p8 = pnand %p1862_p7, %p1856_p4 }
  0x64   :  { %1432 = vmatpush1.bf16.msra.mxu0 %v1705_v15  ;;  %v1117_v15 = vld [vmem:[#allocation7 + $0x60] sm:$0xff]  }
  0x65   :  { %1434 = vmatprep.subr.bf16.mxu0 %v1706_v16  ;;  %v1118_v16 = vld [vmem:[#allocation7 + $0x68] sm:$0xff]  }
  0x66   :  { %1518 = vmatpush3.bf16.msra.mxu1 %v1110_v58  ;;  %v1137_v58 = vld [vmem:[#allocation7 + $0x100] sm:$0xff]  }
  0x67   :  { %1519 = vmatprep.subr.bf16.mxu1 %v1893_v0 }
  0x68   :  { %1436 = vmatpush1.bf16.msra.mxu0 %v1708_v17  ;;  %v1119_v17 = vld [vmem:[#allocation7 + $0x70] sm:$0xff]  }
  0x69   :  { %1438 = vmatprep.subr.bf16.mxu0 %v1709_v18  ;;  %v1120_v18 = vld [vmem:[#allocation7 + $0x78] sm:$0xff]  }
  0x6a   :  { %1521 = vmatpush3.bf16.msra.mxu1 %v1111_v59  ;;  %v1139_v59 = vld [vmem:[#allocation7 + $0x110] sm:$0xff]  }
  0x6b   :  { %1522 = vmatprep.subr.bf16.mxu1 %v1893_v0 }
  0x6c   :  { %1440 = vmatpush1.bf16.msra.mxu0 %v1711_v19  ;;  %v408_v19 = vld [vmem:[#allocation8 + $0x1] ss:$0 sm:$0xff] }
  0x6d   :  { %1442 = vmatprep.subr.bf16.mxu0 %v1712_v20 }
  0x6e   :  { %1524 = vmatpush3.bf16.msra.mxu1 %v1112_v60  ;;  %v224_v60 = vsub.s32 1, %v1986_v62  ;;  %v1141_v62 = vld [vmem:[#allocation7 + $0x120] sm:$0xff]  }
  0x6f   :  { %1525 = vmatprep.subr.bf16.mxu1 %v1893_v0 }
  0x70   :  { %1444 = vmatpush1.bf16.msra.mxu0 %v1714_v22 }
  0x71   :  { %1446 = vmatprep.subr.bf16.mxu0 %v1715_v24 }
  0x74   :  { %1448 = vmatpush1.bf16.msra.mxu0 %v1717_v25 }
  0x75   :  { %1450 = vmatprep.subr.bf16.mxu0 %v1718_v27 }
  0x78   :  { %1452 = vmatpush1.bf16.msra.mxu0 %v1720_v28  ;;  %v1121_v28 = vld [vmem:[#allocation7 + $0x80] sm:$0xff]  }
  0x79   :  { %1454 = vmatprep.subr.bf16.mxu0 %v1721_v29  ;;  %v1122_v29 = vld [vmem:[#allocation7 + $0x88] sm:$0xff]  }
  0x7c   :  { %1456 = vmatpush1.bf16.msra.mxu0 %v1723_v30  ;;  %v1123_v30 = vld [vmem:[#allocation7 + $0x90] sm:$0xff]  }
  0x7d   :  { %1458 = vmatprep.subr.bf16.mxu0 %v1724_v31  ;;  %v1124_v31 = vld [vmem:[#allocation7 + $0x98] sm:$0xff]  }
  0x80   :  { %1460 = vmatpush1.bf16.msra.mxu0 %v1726_v32  ;;  %v589_v32 = vand.u32 127, %v218_v61  ;;  %v225_v61 = vrot.slane %v1989_v1, %v224_v60  ;;  %v1142_v1 = vld [vmem:[#allocation7 + $0x128] sm:$0xff]  }
  0x81   :  { %1462 = vmatprep.subr.bf16.mxu0 %v1727_v33  ;;  %v517_v33 = vld [vmem:[#allocation8 + $0x2] ss:$0 sm:$0xff] }
  0x82   :  { %vm590_vm3 = vcmp.ge.s32.totalorder %v589_v32, 3  ;;  %vm591_vm4 = vcmp.lt.s32.totalorder %v589_v32, 19 }
  0x83   :  { %vm2011_vm5 = vmand %vm590_vm3, %vm591_vm4 }
  0x84   :  { %1464 = vmatpush1.bf16.msra.mxu0 %v1729_v34 }
  0x85   :  { %1466 = vmatprep.subr.bf16.mxu0 %v1730_v35 }
  0x88   :  { %1468 = vmatpush1.bf16.msra.mxu0 %v1732_v36 }
  0x89   :  { %1470 = vmatprep.subr.bf16.mxu0 %v1733_v37 }
  0x8b   :  { %293 = vmatmul.mubr.f32.vlgmr.msra.gmra.mrb[0].mxu0 %v69_v39 }
  0x8c   :  { %1472 = vmatpush1.bf16.msra.mxu0 %v1735_v38  ;;  %363 = vmatprep.mubr.f32.mxu0 %v1894_v42 }
  0x8d   :  { %1474 = vmatprep.subr.bf16.mxu0 %v1736_v40  ;;  %v1125_v40 = vld [vmem:[#allocation7 + $0xa0] sm:$0xff]  }
  0x90   :  { %1476 = vmatpush1.bf16.msra.mxu0 %v1738_v41  ;;  %v1126_v41 = vld [vmem:[#allocation7 + $0xa8] sm:$0xff]  }
  0x91   :  { %1478 = vmatprep.subr.bf16.mxu0 %v1739_v43  ;;  %v1127_v43 = vld [vmem:[#allocation7 + $0xb0] sm:$0xff]  }
  0x94   :  { %1480 = vmatpush1.bf16.msra.mxu0 %v1741_v44  ;;  %v1128_v44 = vld [vmem:[#allocation7 + $0xb8] sm:$0xff]  }
  0x95   :  { %1482 = vmatprep.subr.bf16.mxu0 %v1742_v45  ;;  %v1129_v45 = vld [vmem:[#allocation7 + $0xc0] sm:$0xff]  }
  0x98   :  { %1484 = vmatpush1.bf16.msra.mxu0 %v1744_v46  ;;  %v1130_v46 = vld [vmem:[#allocation7 + $0xc8] sm:$0xff]  }
  0x99   :  { %1486 = vmatprep.subr.bf16.mxu0 %v1745_v47  ;;  %v1131_v47 = vld [vmem:[#allocation7 + $0xd0] sm:$0xff]  }
  0x9c   :  { %1488 = vmatpush1.bf16.msra.mxu0 %v1747_v48 }
  0x9d   :  { %1490 = vmatprep.subr.bf16.mxu0 %v1748_v49 }
  0xa0   :  { %1492 = vmatpush1.bf16.msra.mxu0 %v1750_v50 }
  0xa1   :  { %1494 = vmatprep.subr.bf16.mxu0 %v1751_v51 }
  0xa4   :  { %1496 = vmatpush1.bf16.msra.mxu0 %v1753_v52 }
  0xa5   :  { %1498 = vmatprep.subr.bf16.mxu0 %v1754_v53  ;;  %v1132_v53 = vld [vmem:[#allocation7 + $0xd8] sm:$0xff]  }
  0xa8   :  { %1500 = vmatpush1.bf16.msra.mxu0 %v1756_v54  ;;  %v1133_v54 = vld [vmem:[#allocation7 + $0xe0] sm:$0xff]  }
  0xa9   :  { %1573 = vmatprep.subr.bf16.mxu0 %v1893_v0 }
  0xab   :  { %364 = vmatmul.mubr.f32.vlgmr.msra.gmra.mrb[0].mxu0 %v71_v55  ;;  %v1134_v55 = vld [vmem:[#allocation7 + $0xe8] sm:$0xff]  }
  0xac   :  { %1367 = vmatprep.mubr.msk.f32.mxu0 %vm1895_vm0, %v1894_v42  ;;  %1575 = vmatpush3.bf16.msra.mxu0 %v1129_v45 }
  0xad   :  { %1576 = vmatprep.subr.bf16.mxu0 %v1893_v0 }
  0xb0   :  { %1578 = vmatpush3.bf16.msra.mxu0 %v1130_v46 }
  0xb1   :  { %1579 = vmatprep.subr.bf16.mxu0 %v1893_v0 }
  0xb4   :  { %1581 = vmatpush3.bf16.msra.mxu0 %v1131_v47 }
  0xb5   :  { %1582 = vmatprep.subr.bf16.mxu0 %v1893_v0 }
  0xb8   :  { %1584 = vmatpush3.bf16.msra.mxu0 %v1132_v53 }
  0xb9   :  { %1585 = vmatprep.subr.bf16.mxu0 %v1893_v0 }
  0xbc   :  { %1587 = vmatpush3.bf16.msra.mxu0 %v1133_v54 }
  0xbd   :  { %1588 = vmatprep.subr.bf16.mxu0 %v1893_v0 }
  0xc0   :  { %1590 = vmatpush3.bf16.msra.mxu0 %v1134_v55 }
  0xc1   :  { %1591 = vmatprep.subr.bf16.mxu0 %v1893_v0 }
  0xc4   :  { %1593 = vmatpush3.bf16.msra.mxu0 %v1135_v56 }
  0xc5   :  { %1594 = vmatprep.subr.bf16.mxu0 %v1893_v0 }
  0xc8   :  { %1596 = vmatpush3.bf16.msra.mxu0 %v1136_v57 }
 0x17e   :  { %v365_v3 = vpop.f32.mrb[0].mxu0 }
 0x17f   :  { %v1621_v4 = vadd.f32 %v365_v3, %v221_v2  ;;  %v1992_v5 = vpop.f32.mrb[1].mxu0 }
 0x180   :  { %v1622_v63 = vadd.f32 %v1992_v5, %v225_v61  ;;  %v1143_v5 = vld [vmem:[#allocation7 + $0x130] sm:$0xff]  }
 0x181   :  { %v371_v6 = vmin.f32 %v1621_v4, 0.0  ;;  %vm370_vm1 = vcmp.gt.f32.partialorder %v1621_v4, 0.0 }
 0x183   :  { %v372_v7 = vmul.f32 1.442695, %v371_v6 }
 0x185   :  { %1757 = vpow2.f32 %v372_v7 }
 0x18f   :  { %v1758_v8 = vpop.eup %1757 }
 0x190   :  { %v942_v9 = vadd.f32 -1.0, %v1758_v8 }
 0x192   :  { %v375_v11 = vsel %vm370_vm1, %v1621_v4, %v942_v9 }
 0x193   :  { %1263 = vmatmul.mubr.f32.vlgmr.msra.gmra.mrb[0].mxu1 %v375_v11  ;;  %v1140_v11 = vld [vmem:[#allocation7 + $0x118] sm:$0xff]  }
 0x194   :  { %1527 = vmatpush3.bf16.msra.mxu1 %v1113_v10  ;;  %1297 = vmatprep.mubr.msk.f32.mxu1 %vm1895_vm0, %v1894_v42 }
 0x195   :  { %1528 = vmatprep.subr.bf16.mxu1 %v1893_v0 }
 0x198   :  { %1530 = vmatpush3.bf16.msra.mxu1 %v1114_v12  ;;  %v1144_v12 = vld [vmem:[#allocation7 + $0x138] sm:$0xff]  }
 0x199   :  { %1531 = vmatprep.subr.bf16.mxu1 %v1893_v0 }
 0x19c   :  { %1533 = vmatpush3.bf16.msra.mxu1 %v1115_v13  ;;  %v744_v13 = vld [vmem:[#allocation8 + $0x3] ss:$0 sm:$0xff] }
 0x19d   :  { %1534 = vmatprep.subr.bf16.mxu1 %v1893_v0 }
 0x1a0   :  { %1536 = vmatpush3.bf16.msra.mxu1 %v1116_v14 }
 0x1a1   :  { %1537 = vmatprep.subr.bf16.mxu1 %v1893_v0 }
 0x1a4   :  { %1539 = vmatpush3.bf16.msra.mxu1 %v1117_v15 }
 0x1a5   :  { %1540 = vmatprep.subr.bf16.mxu1 %v1893_v0 }
 0x1a8   :  { %1542 = vmatpush3.bf16.msra.mxu1 %v1118_v16 }
 0x1a9   :  { %1543 = vmatprep.subr.bf16.mxu1 %v1893_v0 }
 0x1ac   :  { %1545 = vmatpush3.bf16.msra.mxu1 %v1119_v17 }
 0x1ad   :  { %1546 = vmatprep.subr.bf16.mxu1 %v1893_v0 }
 0x1b0   :  { %1548 = vmatpush3.bf16.msra.mxu1 %v1120_v18 }
 0x1b1   :  { %1549 = vmatprep.subr.bf16.mxu1 %v1893_v0 }
 0x266   :  { %v475_v20 = vpop.f32.mrb[0].mxu1 }
 0x267   :  { %v476_v21 = vadd.f32 %v475_v20, %v408_v19  ;;  %v1264_v22 = vpop.f32.mrb[1].mxu1 }
 0x268   :  { %v853_v22 = vld [vmem:[#allocation8 + $0x4] ss:$0 sm:$0xff] }
 0x269   :  { %v480_v23 = vmin.f32 %v476_v21, 0.0  ;;  %vm479_vm2 = vcmp.gt.f32.partialorder %v476_v21, 0.0 }
 0x26b   :  { %v481_v24 = vmul.f32 1.442695, %v480_v23 }
 0x26d   :  { %1759 = vpow2.f32 %v481_v24 }
 0x277   :  { %v1760_v25 = vpop.eup %1759 }
 0x278   :  { %v943_v26 = vadd.f32 -1.0, %v1760_v25 }
 0x27a   :  { %v484_v27 = vsel %vm479_vm2, %v476_v21, %v943_v26 }
 0x27b   :  { %1298 = vmatmul.mubr.f32.vlgmr.msra.gmra.mrb[2].mxu1 %v484_v27 }
 0x27c   :  { %1332 = vmatprep.mubr.msk.f32.mxu1 %vm1895_vm0, %v1894_v42  ;;  %1551 = vmatpush3.bf16.msra.mxu1 %v1121_v28 }
 0x27d   :  { %1552 = vmatprep.subr.bf16.mxu1 %v1893_v0 }
 0x280   :  { %1554 = vmatpush3.bf16.msra.mxu1 %v1122_v29 }
 0x281   :  { %1555 = vmatprep.subr.bf16.mxu1 %v1893_v0 }
 0x284   :  { %1557 = vmatpush3.bf16.msra.mxu1 %v1123_v30 }
 0x285   :  { %1558 = vmatprep.subr.bf16.mxu1 %v1893_v0 }
 0x288   :  { %1560 = vmatpush3.bf16.msra.mxu1 %v1124_v31 }
 0x289   :  { %1561 = vmatprep.subr.bf16.mxu1 %v1893_v0 }
 0x28c   :  { %1563 = vmatpush3.bf16.msra.mxu1 %v1125_v40 }
 0x28d   :  { %1564 = vmatprep.subr.bf16.mxu1 %v1893_v0 }
 0x290   :  { %1566 = vmatpush3.bf16.msra.mxu1 %v1126_v41 }
 0x291   :  { %1567 = vmatprep.subr.bf16.mxu1 %v1893_v0 }
 0x294   :  { %1569 = vmatpush3.bf16.msra.mxu1 %v1127_v43 }
 0x295   :  { %1570 = vmatprep.subr.bf16.mxu1 %v1893_v0 }
 0x298   :  { %1572 = vmatpush3.bf16.msra.mxu1 %v1128_v44 }
 0x299   :  { %1597 = vmatprep.subr.bf16.mxu1 %v1893_v0 }
 0x34e   :  { %v584_v34 = vpop.f32.mrb[2].mxu1 }
 0x34f   :  { %v585_v36 = vadd.f32 %v584_v34, %v517_v33  ;;  %v1299_v37 = vpop.f32.mrb[3].mxu1 }
 0x351   :  { %v595_v38 = vsel %vm2011_vm5, %v585_v36, 0.0 }
 0x352   :  { %v596_v39 = vmul.f32 %v595_v38, %v595_v38 }
 0x354   :  { %597 = vadd.xlane.f32.xlu0 %v596_v39 }
 0x3e1   :  { %v598_v48 = vpop.xlane.xlu0 %597 }
 0x3e2   :  { %v599_v49 = vmax.f32 %v598_v48, 1e-24 }
 0x3e4   :  { %1761 = vrsqrt.f32 %v599_v49 }
 0x3ee   :  { %v1762_v50 = vpop.eup %1761 }
 0x3ef   :  { %v601_v51 = vsel %vm2011_vm5, %v1762_v50, 1.0 }
 0x3f0   :  { %v602_v52 = vmul.f32 %v601_v51, %v585_v36 }
 0x3f2   :  { %1333 = vmatmul.mubr.f32.vlgmr.msra.gmra.mrb[4].mxu1 %v602_v52 }
 0x3f3   :  { %1402 = vmatprep.mubr.msk.f32.mxu1 %vm1895_vm0, %v1894_v42  ;;  %1599 = vmatpush3.bf16.msra.mxu1 %v1137_v58  ;;  %v1138_v42 = vld [vmem:[#allocation7 + $0x108] sm:$0xff]  }
 0x3f4   :  { %1600 = vmatprep.subr.bf16.mxu1 %v1893_v0 }
 0x3f7   :  { %1602 = vmatpush3.bf16.msra.mxu1 %v1138_v42 }
 0x3f8   :  { %1603 = vmatprep.subr.bf16.mxu1 %v1893_v0 }
 0x3fb   :  { %1605 = vmatpush3.bf16.msra.mxu1 %v1139_v59 }
 0x3fc   :  { %1606 = vmatprep.subr.bf16.mxu1 %v1893_v0 }
 0x3ff   :  { %1608 = vmatpush3.bf16.msra.mxu1 %v1140_v11 }
 0x400   :  { %1609 = vmatprep.subr.bf16.mxu1 %v1893_v0 }
 0x403   :  { %1611 = vmatpush3.bf16.msra.mxu1 %v1141_v62 }
 0x404   :  { %1612 = vmatprep.subr.bf16.mxu1 %v1893_v0 }
 0x407   :  { %1614 = vmatpush3.bf16.msra.mxu1 %v1142_v1 }
 0x408   :  { %1615 = vmatprep.subr.bf16.mxu1 %v1893_v0 }
 0x40b   :  { %1617 = vmatpush3.bf16.msra.mxu1 %v1143_v5 }
 0x40c   :  { %1618 = vmatprep.subr.bf16.mxu1 %v1893_v0 }
 0x40f   :  { %1620 = vmatpush3.bf16.msra.mxu1 %v1144_v12 }
 0x4c5   :  { %v701_v2 = vpop.f32.mrb[4].mxu1 }
 0x4c6   :  { %v705_v3 = vadd.f32 %v1622_v63, %v701_v2  ;;  %v1334_v4 = vpop.f32.mrb[5].mxu1 }
 0x4c8   :  { %v707_v6 = vmin.f32 %v705_v3, 0.0  ;;  %vm706_vm6 = vcmp.gt.f32.partialorder %v705_v3, 0.0 }
 0x4ca   :  { %v708_v7 = vmul.f32 1.442695, %v707_v6 }
 0x4cc   :  { %1763 = vpow2.f32 %v708_v7 }
 0x4d6   :  { %v1764_v8 = vpop.eup %1763 }
 0x4d7   :  { %v944_v9 = vadd.f32 -1.0, %v1764_v8 }
 0x4d9   :  { %v711_v10 = vsel %vm706_vm6, %v705_v3, %v944_v9 }
 0x4da   :  { %1368 = vmatmul.mubr.f32.vlgmr.msra.gmra.mrb[2].mxu0 %v711_v10 }
 0x5ad   :  { %v811_v14 = vpop.f32.mrb[2].mxu0 }
 0x5ae   :  { %v812_v15 = vadd.f32 %v811_v14, %v744_v13  ;;  %v1369_v16 = vpop.f32.mrb[3].mxu0 }
 0x5b0   :  { %v816_v17 = vmin.f32 %v812_v15, 0.0  ;;  %vm815_vm7 = vcmp.gt.f32.partialorder %v812_v15, 0.0 }
 0x5b2   :  { %v817_v18 = vmul.f32 1.442695, %v816_v17 }
 0x5b4   :  { %1765 = vpow2.f32 %v817_v18 }
 0x5be   :  { %v1766_v19 = vpop.eup %1765 }
 0x5bf   :  { %v945_v20 = vadd.f32 -1.0, %v1766_v19 }
 0x5c1   :  { %v820_v21 = vsel %vm815_vm7, %v812_v15, %v945_v20 }
 0x5c2   :  { %1403 = vmatmul.mubr.f32.vlgmr.msra.gmra.mrb[6].mxu1 %v820_v21 }
 0x695   :  { %v920_v23 = vpop.f32.mrb[6].mxu1 }
 0x696   :  { %v921_v24 = vadd.f32 %v920_v23, %v853_v22  ;;  %v1404_v0 = vpop.f32.mrb[7].mxu1 }
 0x698   :  { %924 = vst [vmem:[#allocation10] sm:$0xff] %v921_v24 }
 0x699   :  { %1866 = shalt.err (!%p1863_p8)
}
 0x69a   :  { %s1867_s15 = scalar_lea.hbm %s2058_s4, 128 }
 0x69b   :  { %p1868_p9 = scmp.ne.s32.totalorder %s2058_s4, %s1867_s15  ;;  %p1871_p10 = scmp.lt.u32.totalorder %s1867_s15, %s2058_s4 }
 0x69d   :  { %p1873_p11 = pnand %p1871_p10, %p1868_p9 }
 0x69f   :  { %1876 = shalt.err (!%p1873_p11)
}
 0x6a0   :  { %934 = dma.vmem_to_hbm [thread:$0]  %s932_s12, 128, %s2058_s4, [#allocation4]  }
 0x6a1   :  { %1883 = dma.done.wait [#allocation4], 128  }
 0x6a2   :  { %1884 = vsyncadd [#allocation4], 4294967168 }
 0x6a3   :  { %938 = vsyncpa [#allocation3], 1 }
 0x6a4   :  { %939 = vsyncpa [#allocation6], 1 }
 0x6a5   :  { %940 = vsyncpa [#allocation9], 1 }
 0x6a6   :  { %941 = vsyncpa [#allocation4], 1 }

</bundles_post_ra>
